<compile_context>
chip_gen: v7x
topology: tpu7x:2x2x1
jax: 0.10.0
libtpu: 0.0.40
codegen_flags: <defaults>
</compile_context>

<pallas_src>
import jax
import jax.numpy as jnp
from jax.experimental import pallas as pl
from jax.experimental.pallas import tpu as pltpu


def _classifier_kernel(x_ref, w_ref, b_ref, o_ref, acc_ref):
    # x_ref: (TM, TK) VMEM   w_ref: (TK, 1) VMEM   b_ref: (1,) f32 SMEM
    # o_ref: (1, 1, TM) VMEM (lane-dense)          acc_ref: (1, TM) f32 VMEM scratch
    k = pl.program_id(1)

    @pl.when(k == 0)
    def _init():
        acc_ref[...] = jnp.zeros_like(acc_ref)

    # Linear(hidden, 1) partial product on the MXU: (TM, TK) @ (TK, 1) -> (TM, 1) with f32
    # accumulation.  The TM partial sums are then folded onto lanes so the accumulator and the
    # final store stay lane-dense (full-width vst, contiguous writeback DMA).
    part = jnp.dot(x_ref[...], w_ref[...], preferred_element_type=jnp.float32)  # (TM, 1) f32
    acc_ref[0, :] = acc_ref[0, :] + part[:, 0]

    @pl.when(k == pl.num_programs(1) - 1)
    def _finalize():
        h = acc_ref[0, :] + b_ref[0]                                   # bias (f32 scalar, SMEM)
        o_ref[0, 0, :] = jnp.maximum(h, 0.01 * h).astype(o_ref.dtype)  # LeakyReLU(0.01)


def _round_up(v, m):
    return ((v + m - 1) // m) * m


def _cdiv(a, b):
    return -(-a // b)


def _pick_tiles(m_rows, hidden, itemsize):
    """Choose (tm, tk, nk).

    ~6 MiB per streamed x tile (double-buffered input stream fits every generation incl. v7x's
    64 MiB VMEM); the budget uses the lane-padded row width since Mosaic pads the minor dim to
    128 lanes in VMEM.  Very large hidden falls back to a K-chunked reduction grid axis."""
    budget = 6 * 1024 * 1024
    lane_h = _round_up(hidden, 128)
    if lane_h * 128 * itemsize <= budget:
        tk, nk = hidden, 1                       # whole hidden dim in one chunk (common case)
        row_bytes = lane_h * itemsize
    else:
        # hidden so large that even a 128-row tile overflows the budget: chunk the reduction.
        tk = max(128, (budget // (256 * itemsize)) // 128 * 128)
        nk = _cdiv(hidden, tk)
        row_bytes = tk * itemsize
    tm = max(128, (budget // row_bytes) // 128 * 128)
    padded_rows = _round_up(max(m_rows, 1), 128)
    tm = min(tm, padded_rows)
    # Prefer >=2 row tiles when possible so v7x's two TensorCores both get work.
    if padded_rows >= 256:
        tm = min(tm, _round_up(_cdiv(padded_rows, 2), 128))
    return max(128, tm), tk, nk


@jax.jit
def simple_classifier(x, weight, bias):
    """x: [..., hidden]; weight: [1, hidden]; bias: [1] -> LeakyReLU(Linear(x)).squeeze(-1)."""
    orig_shape = x.shape
    hidden = orig_shape[-1]
    out_dtype = x.dtype

    x2d = x.reshape(-1, hidden)
    m = x2d.shape[0]

    tm, tk, nk = _pick_tiles(m, hidden, jnp.dtype(x.dtype).itemsize)

    m_padded = _round_up(max(m, 1), tm)
    h_padded = nk * tk
    pad_m = m_padded - m
    pad_h = h_padded - hidden
    if pad_m or pad_h:
        x2d = jnp.pad(x2d, ((0, pad_m), (0, pad_h)))

    # Weight pre-reshaped to a (hidden, 1) column in the wrapper (free) for the MXU matvec;
    # zero-pad the reduction dim to match the K tiling (zeros are inert in the dot).
    w_col = weight.reshape(hidden, 1).astype(x.dtype)
    if pad_h:
        w_col = jnp.pad(w_col, ((0, pad_h), (0, 0)))

    bias_smem = bias.reshape(1).astype(jnp.float32)

    grid_m = m_padded // tm

    out = pl.pallas_call(
        _classifier_kernel,
        out_shape=jax.ShapeDtypeStruct((grid_m, 1, tm), out_dtype),
        grid_spec=pltpu.PrefetchScalarGridSpec(
            num_scalar_prefetch=0,
            grid=(grid_m, nk),
            in_specs=[
                pl.BlockSpec((tm, tk), lambda i, k: (i, k)),          # streamed x tile
                pl.BlockSpec((tk, 1), lambda i, k: (k, 0)),           # weight column chunk
                pl.BlockSpec(memory_space=pltpu.MemorySpace.SMEM),    # bias scalar in SMEM
            ],
            out_specs=pl.BlockSpec((1, 1, tm), lambda i, k: (i, 0, 0)),  # lane-dense output
            scratch_shapes=[pltpu.VMEM((1, tm), jnp.float32)],        # f32 accumulator
        ),
        compiler_params=pltpu.CompilerParams(
            dimension_semantics=("parallel", "arbitrary"),
            vmem_limit_bytes=32 * 1024 * 1024,
        ),
    )(x2d, w_col, bias_smem)

    out = out.reshape(m_padded)[:m].reshape(orig_shape[:-1])
    # The module applies .squeeze(-1) twice: the Linear's size-1 output dim is already dropped by
    # the reshape above; this conditional squeeze reproduces the module's second .squeeze(-1),
    # which (like torch) only drops the trailing dim when it has size 1.
    if out.ndim >= 1 and out.shape[-1] == 1:
        out = jnp.squeeze(out, -1)
    return out
    # TODO(synk): x.requires_grad_(True) is autograd bookkeeping with no forward effect.


def _reference(x, weight, bias):
    h = jnp.einsum("...h,oh->...o", x, weight) + bias
    h = jnp.squeeze(h, -1)
    y = jnp.where(h >= 0, h, 0.01 * h)
    if y.ndim >= 1 and y.shape[-1] == 1:
        y = jnp.squeeze(y, -1)
    return y


if __name__ == "__main__":
    key = jax.random.PRNGKey(0)
    batch, seq, hidden = 2, 8, 32

    kx, kw, kb = jax.random.split(key, 3)
    x = jax.random.normal(kx, (batch, seq, hidden), dtype=jnp.float32)

    # Deterministic init matching nn.Linear default: U(-1/sqrt(H), 1/sqrt(H))
    bound = 1.0 / jnp.sqrt(jnp.float32(hidden))
    weight = jax.random.uniform(kw, (1, hidden), jnp.float32, -bound, bound)
    bias = jax.random.uniform(kb, (1,), jnp.float32, -bound, bound)

    out = jax.block_until_ready(simple_classifier(x, weight, bias))
    ref = _reference(x, weight, bias)
    assert out.shape == (batch, seq), out.shape
    assert jnp.allclose(out, ref, atol=1e-5, rtol=1e-5), "mismatch vs reference"

    # Second shape exercising the row-padding path (m = 15 not a multiple of the tile).
    x2 = jax.random.normal(jax.random.PRNGKey(1), (3, 5, hidden), dtype=jnp.float32)
    out2 = jax.block_until_ready(simple_classifier(x2, weight, bias))
    ref2 = _reference(x2, weight, bias)
    assert out2.shape == (3, 5), out2.shape
    assert jnp.allclose(out2, ref2, atol=1e-5, rtol=1e-5), "mismatch vs reference (padded)"

    print("KERNEL_OK")
</pallas_src>

<mosaic_0001>
module attributes {stable_mosaic.version = 11 : i64} {
  func.func @_classifier_kernel(%arg0: i32, %arg1: i32, %arg2: memref<128x32xf32, #tpu.memory_space<vmem>>, %arg3: memref<32x1xf32, #tpu.memory_space<vmem>>, %arg4: memref<1xf32, #tpu.memory_space<smem>>, %arg5: memref<1x1x128xf32, #tpu.memory_space<vmem>>, %arg6: memref<1x128xf32, #tpu.memory_space<vmem>>) attributes {dimension_semantics = [#tpu.dimension_semantics<parallel>, #tpu.dimension_semantics<arbitrary>], iteration_bounds = array<i64: 1, 1>, scalar_prefetch = 0 : i64, scratch_operands = 1 : i64, tpu.core_type = #tpu.core_type<tc>, window_params = [{transform_indices = @transform_0, window_bounds = array<i64: 128, 32>}, {transform_indices = @transform_1, window_bounds = array<i64: 32, 1>}, {transform_indices = @transform_2, window_bounds = array<i64: 1>}, {transform_indices = @transform_3, window_bounds = array<i64: 1, 1, 128>}]} {
    %c0_i32 = arith.constant 0 : i32
    %0 = arith.cmpi eq, %arg1, %c0_i32 : i32
    %1 = arith.extui %0 : i1 to i32
    %c0_i32_0 = arith.constant 0 : i32
    %2 = arith.cmpi ne, %1, %c0_i32_0 : i32
    scf.if %2 {
      %cst_10 = arith.constant 0.000000e+00 : f32
      %16 = vector.broadcast %cst_10 : f32 to vector<1x128xf32>
      %c0_11 = arith.constant 0 : index
      %c0_12 = arith.constant 0 : index
      %17 = vector.load %arg6[%c0_11, %c0_12] : memref<1x128xf32, #tpu.memory_space<vmem>>, vector<1x128xf32>
      tpu.vector_store %arg6[%c0_11, %c0_12], %16 {strides = array<i32>} : memref<1x128xf32, #tpu.memory_space<vmem>>, vector<1x128xf32>,
    } else {
    }
    %c0 = arith.constant 0 : index
    %c0_1 = arith.constant 0 : index
    %3 = vector.load %arg2[%c0, %c0_1] : memref<128x32xf32, #tpu.memory_space<vmem>>, vector<128x32xf32>
    %c0_2 = arith.constant 0 : index
    %c0_3 = arith.constant 0 : index
    %4 = vector.load %arg3[%c0_2, %c0_3] : memref<32x1xf32, #tpu.memory_space<vmem>>, vector<32x1xf32>
    %cst = arith.constant dense<0.000000e+00> : vector<128x1xf32>
    %5 = tpu.matmul %3, %4, %cst {dimension_numbers = #tpu.dot_dimension_numbers<[1], [0], [0], [1], [0, 0, 1, 1], [], []>} : vector<128x32xf32>, vector<32x1xf32>, vector<128x1xf32> -> vector<128x1xf32>
    %c0_4 = arith.constant 0 : index
    %c0_5 = arith.constant 0 : index
    %6 = vector.load %arg6[%c0_4, %c0_5] : memref<1x128xf32, #tpu.memory_space<vmem>>, vector<1x128xf32>
    %7 = vector.shape_cast %6 : vector<1x128xf32> to vector<128xf32>
    %8 = vector.shape_cast %5 : vector<128x1xf32> to vector<128xf32>
    %9 = arith.addf %7, %8 : vector<128xf32>
    %c0_6 = arith.constant 0 : index
    %c0_7 = arith.constant 0 : index
    %10 = vector.load %arg6[%c0_6, %c0_7] : memref<1x128xf32, #tpu.memory_space<vmem>>, vector<1x128xf32>
    %11 = vector.shape_cast %10 : vector<1x128xf32> to vector<128xf32>
    %12 = vector.shape_cast %9 : vector<128xf32> to vector<1x128xf32>
    tpu.vector_store %arg6[%c0_6, %c0_7], %12 {strides = array<i32>} : memref<1x128xf32, #tpu.memory_space<vmem>>, vector<1x128xf32>,
    %c0_i32_8 = arith.constant 0 : i32
    %13 = arith.cmpi eq, %arg1, %c0_i32_8 : i32
    %14 = arith.extui %13 : i1 to i32
    %c0_i32_9 = arith.constant 0 : i32
    %15 = arith.cmpi ne, %14, %c0_i32_9 : i32
    scf.if %15 {
      %c0_10 = arith.constant 0 : index
      %c0_11 = arith.constant 0 : index
      %16 = vector.load %arg6[%c0_10, %c0_11] : memref<1x128xf32, #tpu.memory_space<vmem>>, vector<1x128xf32>
      %17 = vector.shape_cast %16 : vector<1x128xf32> to vector<128xf32>
      %c0_12 = arith.constant 0 : index
      %18 = memref.load %arg4[%c0_12] : memref<1xf32, #tpu.memory_space<smem>>
      %19 = vector.broadcast %18 : f32 to vector<128xf32>
      %20 = arith.addf %17, %19 : vector<128xf32>
      %cst_13 = arith.constant 0.00999999977 : f32
      %21 = vector.broadcast %cst_13 : f32 to vector<128xf32>
      %22 = arith.mulf %21, %20 : vector<128xf32>
      %23 = arith.maximumf %20, %22 : vector<128xf32>
      %c0_14 = arith.constant 0 : index
      %c0_15 = arith.constant 0 : index
      %c0_16 = arith.constant 0 : index
      %24 = vector.load %arg5[%c0_14, %c0_15, %c0_16] : memref<1x1x128xf32, #tpu.memory_space<vmem>>, vector<1x1x128xf32>
      %25 = vector.shape_cast %24 : vector<1x1x128xf32> to vector<128xf32>
      %26 = vector.shape_cast %23 : vector<128xf32> to vector<1x1x128xf32>
      tpu.vector_store %arg5[%c0_14, %c0_15, %c0_16], %26 {strides = array<i32>} : memref<1x1x128xf32, #tpu.memory_space<vmem>>, vector<1x1x128xf32>,
    } else {
    }
    return
  }
  func.func @transform_0(%arg0: i32, %arg1: i32) -> (i32, i32) {
    %c0_i32 = arith.constant 0 : i32
    return %arg0, %arg1 : i32, i32
  }
  func.func @transform_1(%arg0: i32, %arg1: i32) -> (i32, i32) {
    %c0_i32 = arith.constant 0 : i32
    %c0_i32_0 = arith.constant 0 : i32
    return %arg1, %c0_i32 : i32, i32
  }
  func.func @transform_2(%arg0: i32, %arg1: i32) -> i32 {
    %c0_i32 = arith.constant 0 : i32
    %c0_i32_0 = arith.constant 0 : i32
    return %c0_i32 : i32
  }
  func.func @transform_3(%arg0: i32, %arg1: i32) -> (i32, i32, i32) {
    %c0_i32 = arith.constant 0 : i32
    %c0_i32_0 = arith.constant 0 : i32
    %c0_i32_1 = arith.constant 0 : i32
    return %arg0, %c0_i32, %c0_i32_0 : i32, i32, i32
  }
}

</mosaic_0001>

<bundles_post_ra>
// kernel: simple_classifier.1
= control target key start
LH: loop header
LB: loop body
LE: loop exit
PB: predicated region body
PF: predicated region fallthrough
CT: control target
= control target key end

     0   :  { %vm40_vm0 = vcmask 261120   ;;  %v2126_v22 = vmov 0   ;;  %v2127_v23 = vmov 1966171168   ;;  %v2727_v25 = vlaneseq  ;;  %s2723_s1 = inlined_call_operand.vmem [shape: f32[32,1], index: 1, kind: input, shape index: {}]   ;;  %s2724_s0 = inlined_call_operand.vmem [shape: f32[128,32], index: 0, kind: input, shape index: {}]   ;;  %s2725_s2 = inlined_call_operand.<no memory space> [shape: f32[1], index: 2, kind: input, shape index: {}]   ;;  %s2726_s3 = inlined_call_operand.vmem [shape: f32[1,1,128], index: 3, kind: output, shape index: {}]  }
   0x1   :  { %v36_v0 = vld [vmem:[%s2723_s1] sm:$0xff]  ;;  %v37_v1 = vld [vmem:[%s2723_s1 + $0x8] sm:$0xff]  ;;  %v38_v2 = vld [vmem:[%s2723_s1 + $0x10] sm:$0xff]  ;;  %2125 = vset.pattern.permute.xlu1 %v2126_v22  ;;  %2124 = vset.pattern.permute.xlu0 %v2126_v22  ;;  %v253_v24 = vunpack.c.l.s4 %v2127_v23  ;;  %vm1878_vm1 = vcmask 130112   ;;  %vm1885_vm2 = vcmask 195712   ;;  %vm1892_vm3 = vcmask 261312  }
   0x2   :  { %v2109_v3 = vpack.c.bf16 %v37_v1, %v36_v0  ;;  %v39_v4 = vld [vmem:[%s2723_s1 + $0x18] sm:$0xff]  ;;  %v20_v5 = vld [vmem:[%s2724_s0] sm:$0xff]  ;;  %v21_v8 = vld [vmem:[%s2724_s0 + $0x8] sm:$0xff]  ;;  %v2226_v27 = vshrl.u32 %v2727_v25, 7  ;;  %vm1899_vm4 = vcmask 326912   ;;  %vm1906_vm5 = vcmask 392512  }
   0x3   :  { %v28_v6 = vld [vmem:[%s2724_s0 + $0x40] sm:$0xff]  ;;  %v2113_v7 = vpack.c.bf16 %v39_v4, %v38_v2  ;;  %2085 = vmatprep.mubr.msk.f32.mxu0 %vm40_vm0, %v20_v5  ;;  %v29_v9 = vld [vmem:[%s2724_s0 + $0x48] sm:$0xff]  ;;  %v22_v10 = vld [vmem:[%s2724_s0 + $0x10] sm:$0xff]  ;;  %v254_v26 = vunpack.c.0.s8 %v253_v24  ;;  %vm1913_vm6 = vcmask 458112   ;;  %vm1920_vm7 = vcmask 523712  }
   0x4   :  { %2097 = vmatprep.mubr.msk.f32.mxu1 %vm40_vm0, %v28_v6  ;;  %2110 = vmatprep.subr.bf16.mxu0 %v2109_v3  ;;  %v30_v11 = vld [vmem:[%s2724_s0 + $0x50] sm:$0xff]  ;;  %v23_v12 = vld [vmem:[%s2724_s0 + $0x18] sm:$0xff]  ;;  %v24_v14 = vld [vmem:[%s2724_s0 + $0x20] sm:$0xff]  ;;  %2730 = vst [vmem:[#allocation4_spill] sm:$0xff] %v2226_v27  ;;  %vm1927_vm8 = vcmask 589312   ;;  %vm1934_vm9 = vcmask 654912  }
   0x5   :  { %2117 = vmatprep.subr.bf16.mxu1 %v2109_v3  ;;  %2112 = vmatpush3.bf16.msra.mxu0 %v2109_v3  ;;  %v31_v13 = vld [vmem:[%s2724_s0 + $0x58] sm:$0xff]  ;;  %v32_v15 = vld [vmem:[%s2724_s0 + $0x60] sm:$0xff]  ;;  %v25_v16 = vld [vmem:[%s2724_s0 + $0x28] sm:$0xff]  ;;  %v2229_v28 = vsub.s32 %v254_v26, %v2226_v27  ;;  %vm1941_vm10 = vcmask 720512   ;;  %vm1948_vm11 = vcmask 786112   ;;  %vm1955_vm12 = vcmask 851712  }
   0x6   :  { %2119 = vmatpush3.bf16.msra.mxu1 %v2109_v3  ;;  %2114 = vmatprep.subr.bf16.mxu0 %v2113_v7  ;;  %v33_v17 = vld [vmem:[%s2724_s0 + $0x68] sm:$0xff]  ;;  %v26_v18 = vld [vmem:[%s2724_s0 + $0x30] sm:$0xff]  ;;  %v27_v20 = vld [vmem:[%s2724_s0 + $0x38] sm:$0xff]  ;;  %vm1962_vm13 = vcmask 917312   ;;  %vm1969_vm14 = vcmask 982912   ;;  %vm1976_vm15 = vcmask 1048512  }
   0x7   :  { %2118 = vmatprep.subr.bf16.mxu1 %v2113_v7  ;;  %v34_v19 = vld [vmem:[%s2724_s0 + $0x70] sm:$0xff]  ;;  %v35_v21 = vld [vmem:[%s2724_s0 + $0x78] sm:$0xff] }
   0x9   :  { %2116 = vmatpush3.bf16.msra.mxu0 %v2113_v7 }
   0xa   :  { %2120 = vmatpush3.bf16.msra.mxu1 %v2113_v7 }
   0xc   :  { %2086 = vmatmul.mubr.msk.f32.vlgmr.msra.gmra.mrb[0].mxu0 %vm40_vm0, %v21_v8 }
   0xd   :  { %2098 = vmatmul.mubr.msk.f32.vlgmr.msra.gmra.mrb[0].mxu1 %vm40_vm0, %v29_v9  ;;  %2088 = vmatprep.mubr.msk.f32.mxu0 %vm40_vm0, %v22_v10 }
   0xe   :  { %2100 = vmatprep.mubr.msk.f32.mxu1 %vm40_vm0, %v30_v11 }
  0x10   :  { %2089 = vmatmul.mubr.msk.f32.gmra.mrb[2].mxu0 %vm40_vm0, %v23_v12 }
  0x11   :  { %2101 = vmatmul.mubr.msk.f32.gmra.mrb[2].mxu1 %vm40_vm0, %v31_v13  ;;  %2091 = vmatprep.mubr.msk.f32.mxu0 %vm40_vm0, %v24_v14 }
  0x12   :  { %2103 = vmatprep.mubr.msk.f32.mxu1 %vm40_vm0, %v32_v15 }
  0x14   :  { %2092 = vmatmul.mubr.msk.f32.gmra.mrb[4].mxu0 %vm40_vm0, %v25_v16 }
  0x15   :  { %2104 = vmatmul.mubr.msk.f32.gmra.mrb[4].mxu1 %vm40_vm0, %v33_v17  ;;  %2094 = vmatprep.mubr.msk.f32.mxu0 %vm40_vm0, %v26_v18 }
  0x16   :  { %2106 = vmatprep.mubr.msk.f32.mxu1 %vm40_vm0, %v34_v19 }
  0x18   :  { %2095 = vmatmul.mubr.msk.f32.gmra.mrb[6].mxu0 %vm40_vm0, %v27_v20 }
  0x19   :  { %2107 = vmatmul.mubr.msk.f32.gmra.mrb[6].mxu1 %vm40_vm0, %v35_v21 }
  0xdf   :  { %v2087_v29 = vpop.f32.mrb[0].mxu0 }
  0xe0   :  { %v2099_v30 = vpop.f32.mrb[0].mxu1  ;;  %v300_v31 = vcombine.high %v2087_v29, %v2087_v29  ;;  %v307_v32 = vrot.slane %v2087_v29, %v2229_v28  ;;  %v155_v35 = vpop.f32.mrb[1].mxu0 }
  0xe1   :  { %v692_v33 = vcombine.high %v2099_v30, %v2099_v30  ;;  %v699_v34 = vrot.slane %v2099_v30, %v2229_v28  ;;  %v195_v36 = vpop.f32.mrb[1].mxu1  ;;  %v251_v37 = vcombine.high %v155_v35, %v155_v35  ;;  %v258_v38 = vrot.slane %v155_v35, %v2229_v28 }
  0xe2   :  { %v314_v39 = vrot.slane %v300_v31, %v2229_v28  ;;  %v315_v41 = vcombine.high %v307_v32, %v307_v32  ;;  %v643_v50 = vcombine.high %v195_v36, %v195_v36  ;;  %v650_v54 = vrot.slane %v195_v36, %v2229_v28 }
  0xe3   :  { %v706_v40 = vrot.slane %v692_v33, %v2229_v28  ;;  %v265_v42 = vrot.slane %v251_v37, %v2229_v28  ;;  %v2090_v43 = vpop.f32.mrb[2].mxu0  ;;  %v707_v45 = vcombine.high %v699_v34, %v699_v34  ;;  %v266_v46 = vcombine.high %v258_v38, %v258_v38 }
  0xe4   :  { %v2102_v44 = vpop.f32.mrb[2].mxu1  ;;  %v2237_v47 = vpop.f32.mrb[3].mxu0  ;;  %v316_v49 = vcombine.high %v314_v39, %v314_v39  ;;  %v2242_v53 = vrot.slane %v315_v41, %v2229_v28  ;;  %v2250_v57 = vrot.slane %v307_v32, %v2229_v28  ;;  %v2253_v58 = vrot.slane %v699_v34, %v2229_v28 }
  0xe5   :  { %v2239_v48 = vpop.f32.mrb[3].mxu1  ;;  %v708_v51 = vcombine.high %v706_v40, %v706_v40  ;;  %v267_v52 = vcombine.high %v265_v42, %v265_v42  ;;  %v2256_v59 = vrot.slane %v707_v45, %v2229_v28  ;;  %v288_v60 = vrot.slane %v266_v46, %v2229_v28 }
  0xe6   :  { %v2264_v63 = vrot.slane %v316_v49, %v2229_v28  ;;  %v2267_v0 = vrot.slane %v706_v40, %v2229_v28  ;;  %v274_v1 = vrot.slane %v258_v38, %v2229_v28  ;;  %v657_v2 = vrot.slane %v643_v50, %v2229_v28 }
  0xe7   :  { %v2245_v55 = vpop.f32.mrb[4].mxu0  ;;  %v2272_v3 = vrot.slane %v708_v51, %v2229_v28  ;;  %v295_v4 = vrot.slane %v267_v52, %v2229_v28  ;;  %v398_v5 = vcombine.high %v2090_v43, %v2090_v43  ;;  %v405_v6 = vrot.slane %v2090_v43, %v2229_v28 }
  0xe8   :  { %v2247_v56 = vpop.f32.mrb[4].mxu1  ;;  %v2259_v61 = vpop.f32.mrb[5].mxu0  ;;  %v2277_v7 = vrot.slane %v314_v39, %v2229_v28  ;;  %v658_v10 = vcombine.high %v650_v54, %v650_v54  ;;  %v281_v14 = vrot.slane %v265_v42, %v2229_v28  ;;  %v1035_v15 = vcombine.low %v274_v1, %v288_v60 }
  0xe9   :  { %v2261_v62 = vpop.f32.mrb[5].mxu1  ;;  %v659_v16 = vcombine.high %v657_v2, %v657_v2  ;;  %v412_v21 = vrot.slane %v398_v5, %v2229_v28  ;;  %v413_v22 = vcombine.high %v405_v6, %v405_v6  ;;  %v2025_v26 = vcombine.high %v274_v1, %v288_v60 }
  0xea   :  { %v1037_v29 = vcombine.low %v281_v14, %v295_v4  ;;  %v2026_v30 = vcombine.high %v281_v14, %v295_v4  ;;  %v680_v31 = vrot.slane %v658_v10, %v2229_v28  ;;  %v790_v32 = vcombine.high %v2102_v44, %v2102_v44 }
  0xeb   :  { %v2283_v11 = vpop.f32.mrb[6].mxu0  ;;  %v797_v33 = vrot.slane %v2102_v44, %v2229_v28  ;;  %v2308_v35 = vrot.slane %v1035_v15, %v2229_v28  ;;  %v666_v36 = vrot.slane %v650_v54, %v2229_v28  ;;  %v687_v37 = vrot.slane %v659_v16, %v2229_v28 }
  0xec   :  { %v2285_v12 = vpop.f32.mrb[6].mxu1  ;;  %v2290_v17 = vpop.f32.mrb[7].mxu0  ;;  %v414_v38 = vcombine.high %v412_v21, %v412_v21  ;;  %v421_v39 = vrot.slane %v405_v6, %v2229_v28  ;;  %v435_v40 = vrot.slane %v413_v22, %v2229_v28  ;;  %v804_v41 = vrot.slane %v790_v32, %v2229_v28 }
  0xed   :  { %v2292_v18 = vpop.f32.mrb[7].mxu1  ;;  %v2316_v42 = vrot.slane %v2025_v26, %v2229_v28  ;;  %v2319_v43 = vrot.slane %v1037_v29, %v2229_v28  ;;  %v673_v44 = vrot.slane %v657_v2, %v2229_v28  ;;  %v805_v45 = vcombine.high %v797_v33, %v797_v33 }
  0xee   :  { %v2323_v46 = vrot.slane %v2026_v30, %v2229_v28  ;;  %v1427_v49 = vcombine.low %v666_v36, %v680_v31  ;;  %v2041_v50 = vcombine.high %v666_v36, %v680_v31  ;;  %v428_v51 = vrot.slane %v412_v21, %v2229_v28 }
  0xef   :  { %v1429_v52 = vcombine.low %v673_v44, %v687_v37  ;;  %v2042_v54 = vcombine.high %v673_v44, %v687_v37  ;;  %v806_v60 = vcombine.high %v804_v41, %v804_v41  ;;  %v349_v1 = vcombine.high %v2237_v47, %v2237_v47 }
  0xf0   :  { %v442_v4 = vrot.slane %v414_v38, %v2229_v28  ;;  %v1182_v5 = vcombine.low %v421_v39, %v435_v40  ;;  %v356_v2 = vrot.slane %v2237_v47, %v2229_v28  ;;  %v741_v6 = vcombine.high %v2239_v48, %v2239_v48 }
  0xf1   :  { %v2031_v10 = vcombine.high %v421_v39, %v435_v40  ;;  %v813_v14 = vrot.slane %v797_v33, %v2229_v28  ;;  %v827_v15 = vrot.slane %v805_v45, %v2229_v28  ;;  %v363_v16 = vrot.slane %v349_v1, %v2229_v28 }
  0xf2   :  { %v820_v21 = vrot.slane %v804_v41, %v2229_v28  ;;  %v834_v22 = vrot.slane %v806_v60, %v2229_v28  ;;  %v364_v26 = vcombine.high %v356_v2, %v356_v2  ;;  %v748_v29 = vrot.slane %v2239_v48, %v2229_v28 }
  0xf3   :  { %v2341_v47 = vrot.slane %v1427_v49, %v2229_v28  ;;  %v2344_v30 = vrot.slane %v2041_v50, %v2229_v28  ;;  %v2347_v31 = vrot.slane %v1429_v52, %v2229_v28  ;;  %v755_v32 = vrot.slane %v741_v6, %v2229_v28 }
  0xf4   :  { %v1184_v33 = vcombine.low %v428_v51, %v442_v4  ;;  %v2032_v36 = vcombine.high %v428_v51, %v442_v4  ;;  %v365_v37 = vcombine.high %v363_v16, %v363_v16  ;;  %v386_v38 = vrot.slane %v364_v26, %v2229_v28 }
  0xf5   :  { %v2352_v39 = vrot.slane %v2042_v54, %v2229_v28  ;;  %v2355_v48 = vrot.slane %v1182_v5, %v2229_v28  ;;  %v1574_v40 = vcombine.low %v813_v14, %v827_v15  ;;  %v2047_v41 = vcombine.high %v813_v14, %v827_v15 }
  0xf6   :  { %v2358_v44 = vrot.slane %v2031_v10, %v2229_v28  ;;  %v1576_v45 = vcombine.low %v820_v21, %v834_v22  ;;  %v372_v49 = vrot.slane %v356_v2, %v2229_v28  ;;  %v756_v50 = vcombine.high %v748_v29, %v748_v29 }
  0xf7   :  { %v2048_v52 = vcombine.high %v820_v21, %v834_v22  ;;  %v757_v51 = vcombine.high %v755_v32, %v755_v32  ;;  %v496_v60 = vcombine.high %v2245_v55, %v2245_v55  ;;  %v503_v54 = vrot.slane %v2245_v55, %v2229_v28 }
  0xf8   :  { %v2366_v1 = vrot.slane %v1184_v33, %v2229_v28  ;;  %v2369_v4 = vrot.slane %v2032_v36, %v2229_v28  ;;  %v393_v5 = vrot.slane %v365_v37, %v2229_v28  ;;  %v1133_v6 = vcombine.low %v372_v49, %v386_v38 }
  0xf9   :  { %v2373_v2 = vrot.slane %v1574_v40, %v2229_v28  ;;  %v2376_v10 = vrot.slane %v2047_v41, %v2229_v28  ;;  %v379_v14 = vrot.slane %v363_v16, %v2229_v28  ;;  %v2029_v15 = vcombine.high %v372_v49, %v386_v38 }
  0xfa   :  { %v2380_v55 = vrot.slane %v1576_v45, %v2229_v28  ;;  %v764_v21 = vrot.slane %v748_v29, %v2229_v28  ;;  %v778_v22 = vrot.slane %v756_v50, %v2229_v28  ;;  %v510_v26 = vrot.slane %v496_v60, %v2229_v28 }
  0xfb   :  { %v2386_v33 = vrot.slane %v2048_v52, %v2229_v28  ;;  %v771_v36 = vrot.slane %v755_v32, %v2229_v28  ;;  %v785_v37 = vrot.slane %v757_v51, %v2229_v28  ;;  %v511_v40 = vcombine.high %v503_v54, %v503_v54 }
  0xfc   :  { %v1135_v41 = vcombine.low %v379_v14, %v393_v5  ;;  %v2030_v16 = vcombine.high %v379_v14, %v393_v5  ;;  %v2391_v38 = vrot.slane %v1133_v6, %v2229_v28  ;;  %v512_v45 = vcombine.high %v510_v26, %v510_v26 }
  0xfd   :  { %v2394_v29 = vrot.slane %v2029_v15, %v2229_v28  ;;  %v447_v49 = vcombine.high %v2259_v61, %v2259_v61  ;;  %v454_v50 = vrot.slane %v2259_v61, %v2229_v28  ;;  %v594_v32 = vcombine.high %v2283_v11, %v2283_v11 }
  0xfe   :  { %v1525_v52 = vcombine.low %v764_v21, %v778_v22  ;;  %v519_v51 = vrot.slane %v503_v54, %v2229_v28  ;;  %v526_v60 = vrot.slane %v510_v26, %v2229_v28  ;;  %v601_v5 = vrot.slane %v2283_v11, %v2229_v28 }
  0xff   :  { %v533_v6 = vrot.slane %v511_v40, %v2229_v28  ;;  %v540_v14 = vrot.slane %v512_v45, %v2229_v28  ;;  %v461_v15 = vrot.slane %v447_v49, %v2229_v28  ;;  %v462_v25 = vcombine.high %v454_v50, %v454_v50 }
 0x100   :  { %v2045_v23 = vcombine.high %v764_v21, %v778_v22  ;;  %v1527_v61 = vcombine.low %v771_v36, %v785_v37  ;;  %v2046_v19 = vcombine.high %v771_v36, %v785_v37  ;;  %v608_v9 = vrot.slane %v594_v32, %v2229_v28 }
 0x101   :  { %v463_v8 = vcombine.high %v461_v15, %v461_v15  ;;  %v470_v54 = vrot.slane %v454_v50, %v2229_v28  ;;  %v484_v26 = vrot.slane %v462_v25, %v2229_v28  ;;  %v545_v11 = vcombine.high %v2290_v17, %v2290_v17 }
 0x102   :  { %v2415_v40 = vrot.slane %v1135_v41, %v2229_v28  ;;  %v2418_v45 = vrot.slane %v2030_v16, %v2229_v28  ;;  %v2421_v21 = vrot.slane %v1525_v52, %v2229_v28  ;;  %v609_v22 = vcombine.high %v601_v5, %v601_v5 }
 0x103   :  { %v1280_v36 = vcombine.low %v519_v51, %v533_v6  ;;  %v2035_v37 = vcombine.high %v519_v51, %v533_v6  ;;  %v1282_v49 = vcombine.low %v526_v60, %v540_v14  ;;  %v2036_v32 = vcombine.high %v526_v60, %v540_v14 }
 0x104   :  { %v477_v50 = vrot.slane %v461_v15, %v2229_v28  ;;  %v491_v25 = vrot.slane %v463_v8, %v2229_v28  ;;  %v610_v34 = vcombine.high %v608_v9, %v608_v9  ;;  %v552_v41 = vrot.slane %v2290_v17, %v2229_v28 }
 0x105   :  { %v2428_v24 = vrot.slane %v2045_v23, %v2229_v28  ;;  %v1231_v16 = vcombine.low %v470_v54, %v484_v26  ;;  %v2033_v20 = vcombine.high %v470_v54, %v484_v26  ;;  %v559_v52 = vrot.slane %v545_v11, %v2229_v28 }
 0x106   :  { %v2432_v13 = vrot.slane %v1527_v61, %v2229_v28  ;;  %v2435_v51 = vrot.slane %v2046_v19, %v2229_v28  ;;  %v617_v60 = vrot.slane %v601_v5, %v2229_v28  ;;  %v631_v8 = vrot.slane %v609_v22, %v2229_v28 }
 0x107   :  { %v2440_v6 = vrot.slane %v1280_v36, %v2229_v28  ;;  %v2443_v17 = vrot.slane %v2035_v37, %v2229_v28  ;;  %v2446_v23 = vrot.slane %v1282_v49, %v2229_v28  ;;  %v560_v14 = vcombine.high %v552_v41, %v552_v41 }
 0x108   :  { %v2449_v15 = vrot.slane %v2036_v32, %v2229_v28  ;;  %v1233_v61 = vcombine.low %v477_v50, %v491_v25  ;;  %v624_v19 = vrot.slane %v608_v9, %v2229_v28  ;;  %v638_v5 = vrot.slane %v610_v34, %v2229_v28 }
 0x109   :  { %v2034_v54 = vcombine.high %v477_v50, %v491_v25  ;;  %v2454_v26 = vrot.slane %v1231_v16, %v2229_v28  ;;  %v2457_v11 = vrot.slane %v2033_v20, %v2229_v28  ;;  %v561_v22 = vcombine.high %v559_v52, %v559_v52 }
 0x10a   :  { %v1378_v36 = vcombine.low %v617_v60, %v631_v8  ;;  %v568_v37 = vrot.slane %v552_v41, %v2229_v28  ;;  %v582_v49 = vrot.slane %v560_v14, %v2229_v28  ;;  %v888_v32 = vcombine.high %v2247_v56, %v2247_v56 }
 0x10b   :  { %2731 = vst [vmem:[#allocation5_spill] sm:$0xff] %v2454_v26  ;;  %v2039_v27 = vcombine.high %v617_v60, %v631_v8  ;;  %v895_v9 = vrot.slane %v2247_v56, %v2229_v28  ;;  %v2732_v34 = vcombine.low %v2253_v58, %v2256_v59  ;;  %v2733_v20 = vcombine.high %v2253_v58, %v2256_v59 }
 0x10c   :  { %v1380_v41 = vcombine.low %v624_v19, %v638_v5  ;;  %v2040_v16 = vcombine.high %v624_v19, %v638_v5  ;;  %v902_v14 = vrot.slane %v888_v32, %v2229_v28  ;;  %v2734_v60 = vcombine.low %v2267_v0, %v2272_v3 }
 0x10d   :  { %v1486_v50 = vrot.slane %v2732_v34, %v2229_v28  ;;  %v1493_v25 = vrot.slane %v2733_v20, %v2229_v28  ;;  %v2479_v56 = vrot.slane %v1233_v61, %v2229_v28  ;;  %v2482_v26 = vrot.slane %v2034_v54, %v2229_v28 }
 0x10e   :  { %v1500_v8 = vrot.slane %v2734_v60, %v2229_v28  ;;  %v575_v34 = vrot.slane %v559_v52, %v2229_v28  ;;  %v589_v58 = vrot.slane %v561_v22, %v2229_v28  ;;  %v2487_v59 = vrot.slane %v1378_v36, %v2229_v28 }
 0x10f   :  { %v1329_v19 = vcombine.low %v568_v37, %v582_v49  ;;  %v2037_v5 = vcombine.high %v568_v37, %v582_v49  ;;  %v2736_v32 = vcombine.high %v2267_v0, %v2272_v3  ;;  %v903_v60 = vcombine.high %v895_v9, %v895_v9 }
 0x110   :  { %2735 = vst [vmem:[#allocation6_spill] sm:$0xff] %v2487_v59  ;;  %v1508_v61 = vcombine.low %v1486_v50, %v1493_v25  ;;  %v839_v54 = vcombine.high %v2261_v62, %v2261_v62  ;;  %v846_v52 = vrot.slane %v2261_v62, %v2229_v28  ;;  %v2498_v22 = vrot.slane %v2039_v27, %v2229_v28 }
 0x111   :  { %v1507_v20 = vrot.slane %v2736_v32, %v2229_v28  ;;  %v2501_v36 = vrot.slane %v1380_v41, %v2229_v28  ;;  %v904_v37 = vcombine.high %v902_v14, %v902_v14  ;;  %v2504_v59 = vrot.slane %v2040_v16, %v2229_v28 }
 0x112   :  { %v1331_v0 = vcombine.low %v575_v34, %v589_v58  ;;  %v853_v3 = vrot.slane %v839_v54, %v2229_v28  ;;  %v854_v50 = vcombine.high %v846_v52, %v846_v52  ;;  %v2038_v25 = vcombine.high %v575_v34, %v589_v58 }
 0x113   :  { %v1509_v49 = vcombine.low %v1500_v8, %v1507_v20  ;;  %v2508_v32 = vrot.slane %v1329_v19, %v2229_v28  ;;  %v911_v62 = vrot.slane %v895_v9, %v2229_v28  ;;  %v2738_v27 = vcombine.low %v2250_v57, %v2242_v53 }
 0x114   :  { %v2516_v8 = vrot.slane %v2037_v5, %v2229_v28  ;;  %v925_v16 = vrot.slane %v903_v60, %v2229_v28  ;;  %v1516_v20 = vrot.slane %v1508_v61, %v2229_v28  ;;  %v918_v34 = vrot.slane %v902_v14, %v2229_v28 }
 0x115   :  { %2737 = vst [vmem:[#allocation7_spill] sm:$0xff] %v2508_v32  ;;  %v1094_v41 = vrot.slane %v2738_v27, %v2229_v28  ;;  %v1523_v54 = vrot.slane %v1509_v49, %v2229_v28  ;;  %v932_v58 = vrot.slane %v904_v37, %v2229_v28  ;;  %v2740_v9 = vcombine.high %v2250_v57, %v2242_v53 }
 0x116   :  { %2739 = vst [vmem:[#allocation8_spill] sm:$0xff] %v2516_v8  ;;  %v2741_v5 = vcombine.low %v2277_v7, %v2264_v63  ;;  %v855_v60 = vcombine.high %v853_v3, %v853_v3  ;;  %v862_v61 = vrot.slane %v846_v52, %v2229_v28  ;;  %v876_v49 = vrot.slane %v854_v50, %v2229_v28 }
 0x117   :  { %v1101_v19 = vrot.slane %v2740_v9, %v2229_v28  ;;  %v1524_v32 = vcombine.low %v1516_v20, %v1523_v54  ;;  %v2742_v14 = vcombine.high %v2277_v7, %v2264_v63  ;;  %v986_v53 = vcombine.high %v2285_v12, %v2285_v12 }
 0x118   :  { %v1108_v27 = vrot.slane %v2741_v5, %v2229_v28  ;;  %v993_v57 = vrot.slane %v2285_v12, %v2229_v28  ;;  %v2542_v9 = vrot.slane %v1331_v0, %v2229_v28  ;;  %v2545_v20 = vrot.slane %v2038_v25, %v2229_v28 }
 0x119   :  { %v1115_v37 = vrot.slane %v2742_v14, %v2229_v28  ;;  %v1116_v8 = vcombine.low %v1094_v41, %v1101_v19  ;;  %v1672_v52 = vcombine.low %v911_v62, %v925_v16  ;;  %v2051_v50 = vcombine.high %v911_v62, %v925_v16  ;;  %1847 = vperm.xlu1 %2125, %v1524_v32  }
 0x11a   :  { %2743 = vst [vmem:[#allocation9_spill] sm:$0xff] %v2542_v9  ;;  %v1674_v54 = vcombine.low %v918_v34, %v932_v58  ;;  %v2052_v5 = vcombine.high %v918_v34, %v932_v58  ;;  %v1000_v7 = vrot.slane %v986_v53, %v2229_v28  ;;  %v869_v41 = vrot.slane %v853_v3, %v2229_v28 }
 0x11b   :  { %v1117_v63 = vcombine.low %v1108_v27, %v1115_v37  ;;  %v883_v19 = vrot.slane %v855_v60, %v2229_v28  ;;  %v1001_v14 = vcombine.high %v993_v57, %v993_v57  ;;  %v937_v12 = vcombine.high %v2292_v18, %v2292_v18 }
 0x11c   :  { %v1623_v0 = vcombine.low %v862_v61, %v876_v49  ;;  %v2049_v9 = vcombine.high %v862_v61, %v876_v49  ;;  %v1124_v25 = vrot.slane %v1116_v8, %v2229_v28  ;;  %v2555_v32 = vrot.slane %v1672_v52, %v2229_v28 }
 0x11d   :  { %v1131_v62 = vrot.slane %v1117_v63, %v2229_v28  ;;  %v1002_v16 = vcombine.high %v1000_v7, %v1000_v7  ;;  %v944_v34 = vrot.slane %v2292_v18, %v2229_v28  ;;  %v1068_v3 = vcombine.low %v2319_v43, %v2323_v46 }
 0x11e   :  { %v2562_v58 = vrot.slane %v2051_v50, %v2229_v28  ;;  %v951_v60 = vrot.slane %v937_v12, %v2229_v28  ;;  %v1067_v8 = vcombine.low %v2308_v35, %v2316_v42  ;;  %v1625_v61 = vcombine.low %v869_v41, %v883_v19 }
 0x11f   :  { %v1132_v27 = vcombine.low %v1124_v25, %v1131_v62  ;;  %v2050_v49 = vcombine.high %v869_v41, %v883_v19  ;;  %v2568_v37 = vrot.slane %v993_v57, %v2229_v28  ;;  %v2571_v53 = vrot.slane %v1001_v14, %v2229_v28 }
 0x120   :  { %v2574_v18 = vrot.slane %v1674_v54, %v2229_v28  ;;  %v2577_v43 = vrot.slane %v2052_v5, %v2229_v28  ;;  %v2580_v46 = vrot.slane %v1623_v0, %v2229_v28  ;;  %v2583_v52 = vrot.slane %v2049_v9, %v2229_v28 }
 0x121   :  { %1823 = vperm.xlu0 %2124, %v1132_v27   ;;  %v2586_v35 = vrot.slane %v1000_v7, %v2229_v28  ;;  %v2589_v42 = vrot.slane %v1002_v16, %v2229_v28  ;;  %v952_v57 = vcombine.high %v944_v34, %v944_v34  ;;  %v1082_v50 = vrot.slane %v1068_v3, %v2229_v28 }
 0x122   :  { %v953_v54 = vcombine.high %v951_v60, %v951_v60  ;;  %v1075_v5 = vrot.slane %v1067_v8, %v2229_v28  ;;  %v1214_v63 = vcombine.low %v2355_v48, %v2358_v44  ;;  %v1215_v9 = vcombine.low %v2366_v1, %v2369_v4 }
 0x123   :  { %v2598_v41 = vrot.slane %v1625_v61, %v2229_v28  ;;  %v2601_v7 = vrot.slane %v2050_v49, %v2229_v28  ;;  %v1770_v19 = vcombine.low %v2568_v37, %v2571_v53  ;;  %v2055_v14 = vcombine.high %v2568_v37, %v2571_v53 }
 0x124   :  { %v1083_v12 = vcombine.low %v1075_v5, %v1082_v50  ;;  %v1222_v0 = vrot.slane %v1214_v63, %v2229_v28  ;;  %v1229_v48 = vrot.slane %v1215_v9, %v2229_v28  ;;  %v1459_v44 = vcombine.low %v2341_v47, %v2344_v30 }
 0x125   :  { %v1772_v1 = vcombine.low %v2586_v35, %v2589_v42  ;;  %v960_v4 = vrot.slane %v944_v34, %v2229_v28  ;;  %v967_v25 = vrot.slane %v951_v60, %v2229_v28  ;;  %v974_v62 = vrot.slane %v952_v57, %v2229_v28 }
 0x126   :  { %v981_v16 = vrot.slane %v953_v54, %v2229_v28  ;;  %1820 = vperm.xlu0 %2124, %v1083_v12   ;;  %v1230_v3 = vcombine.low %v1222_v0, %v1229_v48  ;;  %v1460_v27 = vcombine.low %v2347_v31, %v2352_v39  ;;  %v1606_v8 = vcombine.low %v2373_v2, %v2376_v10 }
 0x127   :  { %v1467_v47 = vrot.slane %v1459_v44, %v2229_v28  ;;  %v1607_v30 = vcombine.low %v2380_v55, %v2386_v33  ;;  %v1557_v34 = vcombine.low %v2421_v21, %v2428_v24  ;;  %v1558_v60 = vcombine.low %v2432_v13, %v2435_v51 }
 0x128   :  { %1829 = vperm.xlu1 %2125, %v1230_v3   ;;  %v1474_v61 = vrot.slane %v1460_v27, %v2229_v28  ;;  %v1614_v49 = vrot.slane %v1606_v8, %v2229_v28  ;;  %v1165_v31 = vcombine.low %v2391_v38, %v2394_v29  ;;  %v1166_v39 = vcombine.low %v2415_v40, %v2418_v45  ;;  %v2744_v45 = vld [vmem:[#allocation5_spill] sm:$0xff] }
 0x129   :  { %v2056_v2 = vcombine.high %v2586_v35, %v2589_v42  ;;  %v2637_v10 = vrot.slane %v1770_v19, %v2229_v28  ;;  %v1621_v24 = vrot.slane %v1607_v30, %v2229_v28  ;;  %v1312_v13 = vcombine.low %v2440_v6, %v2443_v17  ;;  %v2745_v42 = vld [vmem:[#allocation6_spill] sm:$0xff] }
 0x12a   :  { %v1475_v55 = vcombine.low %v1467_v47, %v1474_v61  ;;  %v1565_v33 = vrot.slane %v1557_v34, %v2229_v28  ;;  %v1572_v21 = vrot.slane %v1558_v60, %v2229_v28  ;;  %v1180_v38 = vrot.slane %v1166_v39, %v2229_v28 }
 0x12b   :  { %v1622_v29 = vcombine.low %v1614_v49, %v1621_v24  ;;  %v1313_v40 = vcombine.low %v2446_v23, %v2449_v15  ;;  %v1263_v51 = vcombine.low %v2744_v45, %v2457_v11  ;;  %v1264_v37 = vcombine.low %v2479_v56, %v2482_v26  ;;  %v2746_v23 = vld [vmem:[#allocation8_spill] sm:$0xff]  ;;  %v2747_v15 = vld [vmem:[#allocation7_spill] sm:$0xff]  ;;  %v2748_v11 = vld [vmem:[#allocation9_spill] sm:$0xff] }
 0x12c   :  { %v1721_v53 = vcombine.low %v960_v4, %v974_v62  ;;  %v2053_v35 = vcombine.high %v960_v4, %v974_v62  ;;  %v1723_v6 = vcombine.low %v967_v25, %v981_v16  ;;  %1844 = vperm.xlu0 %2124, %v1475_v55   ;;  %v1173_v17 = vrot.slane %v1165_v31, %v2229_v28 }
 0x12d   :  { %1853 = vperm.xlu1 %2125, %v1622_v29   ;;  %v1410_v57 = vcombine.low %v2745_v42, %v2498_v22  ;;  %v1411_v50 = vcombine.low %v2501_v36, %v2504_v59  ;;  %v1361_v54 = vcombine.low %v2747_v15, %v2746_v23  ;;  %v1362_v5 = vcombine.low %v2748_v11, %v2545_v20 }
 0x12e   :  { %v2054_v26 = vcombine.high %v967_v25, %v981_v16  ;;  %v1573_v56 = vcombine.low %v1565_v33, %v1572_v21  ;;  %v1271_v63 = vrot.slane %v1263_v51, %v2229_v28  ;;  %v1278_v9 = vrot.slane %v1264_v37, %v2229_v28 }
 0x12f   :  { %v1787_v19 = vrot.slane %v2055_v14, %v2229_v28  ;;  %v1181_v12 = vcombine.low %v1173_v17, %v1180_v38  ;;  %v1320_v22 = vrot.slane %v1312_v13, %v2229_v28  ;;  %v1327_v0 = vrot.slane %v1313_v40, %v2229_v28 }
 0x130   :  { %v1794_v59 = vrot.slane %v1772_v1, %v2229_v28  ;;  %v1731_v36 = vrot.slane %v1721_v53, %v2229_v28  ;;  %v1738_v48 = vrot.slane %v2053_v35, %v2229_v28  ;;  %v1745_v20 = vrot.slane %v1723_v6, %v2229_v28  ;;  %1850 = vperm.xlu0 %2124, %v1573_v56   ;;  %v2750_v53 = vld [vmem:[#allocation4_spill] sm:$0xff] }
 0x131   :  { %1826 = vperm.xlu1 %2125, %v1181_v12   ;;  %v1418_v44 = vrot.slane %v1410_v57, %v2229_v28  ;;  %v1425_v4 = vrot.slane %v1411_v50, %v2229_v28  ;;  %v1369_v14 = vrot.slane %v1361_v54, %v2229_v28  ;;  %v1376_v25 = vrot.slane %v1362_v5, %v2229_v28 }
 0x132   :  { %v1752_v62 = vrot.slane %v2054_v26, %v2229_v28  ;;  %v1279_v16 = vcombine.low %v1271_v63, %v1278_v9  ;;  %v1655_v1 = vcombine.low %v2580_v46, %v2583_v52  ;;  %v1656_v3 = vcombine.low %v2598_v41, %v2601_v7 }
 0x133   :  { %v1801_v27 = vrot.slane %v2056_v2, %v2229_v28  ;;  %v1328_v8 = vcombine.low %v1320_v22, %v1327_v0  ;;  %v1704_v47 = vcombine.low %v2555_v32, %v2562_v58  ;;  %v1705_v30 = vcombine.low %v2574_v18, %v2577_v43 }
 0x134   :  { %1832 = vperm.xlu0 %2124, %v1279_v16   ;;  %v1426_v34 = vcombine.low %v1418_v44, %v1425_v4  ;;  %v1377_v60 = vcombine.low %v1369_v14, %v1376_v25  ;;  %v1663_v61 = vrot.slane %v1655_v1, %v2229_v28  ;;  %v1670_v46 = vrot.slane %v1656_v3, %v2229_v28 }
 0x135   :  { %1835 = vperm.xlu1 %2125, %v1328_v8   ;;  %v1753_v52 = vcombine.low %v1731_v36, %v1738_v48  ;;  %v1754_v49 = vcombine.low %v1745_v20, %v1752_v62  ;;  %v1712_v41 = vrot.slane %v1704_v47, %v2229_v28  ;;  %v1719_v7 = vrot.slane %v1705_v30, %v2229_v28 }
 0x136   :  { %v1802_v31 = vcombine.low %v2637_v10, %v1787_v19  ;;  %v1803_v32 = vcombine.low %v1794_v59, %v1801_v27  ;;  %v1671_v58 = vcombine.low %v1663_v61, %v1670_v46  ;;  %v2128_v10 = vmov 0.0  }
 0x137   :  { %v1761_v18 = vrot.slane %v1753_v52, %v2229_v28  ;;  %v1768_v43 = vrot.slane %v1754_v49, %v2229_v28  ;;  %v1720_v39 = vcombine.low %v1712_v41, %v1719_v7  ;;  %19 = vst [vmem:[#allocation2] sm:$0x1] %v2128_v10  ;;  %v2749_v38 = vlaneseq }
 0x138   :  { %1838 = vperm.xlu0 %2124, %v1377_v60   ;;  %v1810_v2 = vrot.slane %v1802_v31, %v2229_v28  ;;  %v1817_v24 = vrot.slane %v1803_v32, %v2229_v28 }
 0x139   :  { %1841 = vperm.xlu1 %2125, %v1426_v34   ;;  %v1769_v13 = vcombine.low %v1761_v18, %v1768_v43  ;;  %v1868_v29 = vand.u32 127, %v2749_v38 }
 0x13a   :  { %v1818_v55 = vcombine.low %v1810_v2, %v1817_v24 }
 0x13b   :  { %v1873_v51 = vadd.s32 4294967288, %v1868_v29  ;;  %v1880_v37 = vadd.s32 4294967280, %v1868_v29  ;;  %v1871_v35 = vsub.s32 %v1868_v29, %v2750_v53  ;;  %v1887_v6 = vadd.s32 4294967272, %v1868_v29 }
 0x13c   :  { %1856 = vperm.xlu0 %2124, %v1671_v58   ;;  %v1894_v50 = vadd.s32 4294967264, %v1868_v29  ;;  %v1901_v15 = vadd.s32 4294967256, %v1868_v29  ;;  %v1908_v9 = vadd.s32 4294967248, %v1868_v29  ;;  %v1915_v22 = vadd.s32 4294967240, %v1868_v29 }
 0x13d   :  { %1859 = vperm.xlu1 %2125, %v1720_v39   ;;  %v1876_v42 = vsub.s32 %v1873_v51, %v2750_v53  ;;  %v1883_v23 = vsub.s32 %v1880_v37, %v2750_v53  ;;  %v1890_v11 = vsub.s32 %v1887_v6, %v2750_v53  ;;  %v1929_v0 = vadd.s32 4294967224, %v1868_v29 }
 0x13e   :  { %v1897_v63 = vsub.s32 %v1894_v50, %v2750_v53  ;;  %v1904_v12 = vsub.s32 %v1901_v15, %v2750_v53  ;;  %v1922_v36 = vadd.s32 4294967232, %v1868_v29  ;;  %v1943_v20 = vadd.s32 4294967208, %v1868_v29 }
 0x13f   :  { %v1936_v14 = vadd.s32 4294967216, %v1868_v29  ;;  %v1911_v16 = vsub.s32 %v1908_v9, %v2750_v53  ;;  %v1918_v27 = vsub.s32 %v1915_v22, %v2750_v53  ;;  %v1950_v30 = vadd.s32 4294967200, %v1868_v29 }
 0x140   :  { %1862 = vperm.xlu0 %2124, %v1769_v13   ;;  %v1925_v8 = vsub.s32 %v1922_v36, %v2750_v53  ;;  %v1932_v34 = vsub.s32 %v1929_v0, %v2750_v53  ;;  %v1946_v60 = vsub.s32 %v1943_v20, %v2750_v53  ;;  %v1957_v46 = vadd.s32 4294967192, %v1868_v29 }
 0x141   :  { %1865 = vperm.xlu1 %2125, %v1818_v55   ;;  %v1939_v52 = vsub.s32 %v1936_v14, %v2750_v53  ;;  %v1964_v7 = vadd.s32 4294967184, %v1868_v29  ;;  %v1971_v58 = vadd.s32 4294967176, %v1868_v29  ;;  %v1953_v39 = vsub.s32 %v1950_v30, %v2750_v53 }
 0x142   :  { %v1960_v13 = vsub.s32 %v1957_v46, %v2750_v53 }
 0x143   :  { %v1974_v51 = vsub.s32 %v1971_v58, %v2750_v53 }
 0x198   :  { %v2692_v21 = vpop.permute.xlu1 %1847 }
 0x199   :  { %v1933_v2 = vrot.slane %v2692_v21, %v1932_v34 }
 0x1a0   :  { %v1824_v33 = vpop.permute.xlu0 %1823 }
 0x1a1   :  { %v1877_v26 = vrot.slane %v1824_v33, %v1876_v42 }
 0x1a5   :  { %v1821_v40 = vpop.permute.xlu0 %1820 }
 0x1a6   :  { %v1872_v54 = vrot.slane %v1821_v40, %v1871_v35  ;;  %v1967_v40 = vsub.s32 %v1964_v7, %v2750_v53 }
 0x1a7   :  { %v1830_v45 = vpop.permute.xlu1 %1829 }
 0x1a8   :  { %v1879_v59 = vsel %vm1878_vm1, %v1877_v26, %v1872_v54  ;;  %v1891_v48 = vrot.slane %v1830_v45, %v1890_v11  ;;  %v234_v26 = vld [vmem:[#allocation2] sm:$0x1] }
 0x1ab   :  { %v1845_v17 = vpop.permute.xlu0 %1844 }
 0x1ac   :  { %v2697_v57 = vpop.permute.xlu1 %1853  ;;  %v1926_v18 = vrot.slane %v1845_v17, %v1925_v8 }
 0x1ad   :  { %v1947_v29 = vrot.slane %v2697_v57, %v1946_v60 }
 0x1af   :  { %v1851_v5 = vpop.permute.xlu0 %1850 }
 0x1b0   :  { %v1827_v56 = vpop.permute.xlu1 %1826  ;;  %v1940_v10 = vrot.slane %v1851_v5, %v1939_v52 }
 0x1b1   :  { %v1884_v19 = vrot.slane %v1827_v56, %v1883_v23 }
 0x1b3   :  { %v1886_v44 = vsel %vm1885_vm2, %v1884_v19, %v1879_v59  ;;  %v1833_v4 = vpop.permute.xlu0 %1832 }
 0x1b4   :  { %v1836_v25 = vpop.permute.xlu1 %1835  ;;  %v1898_v62 = vrot.slane %v1833_v4, %v1897_v63  ;;  %v1893_v3 = vsel %vm1892_vm3, %v1891_v48, %v1886_v44  ;;  %v2000_v63 = vstv %s2725_s2 }
 0x1b5   :  { %v1905_v1 = vrot.slane %v1836_v25, %v1904_v12 }
 0x1b6   :  { %v1900_v47 = vsel %vm1899_vm4, %v1898_v62, %v1893_v3 }
 0x1b7   :  { %v1839_v61 = vpop.permute.xlu0 %1838  ;;  %v1907_v32 = vsel %vm1906_vm5, %v1905_v1, %v1900_v47 }
 0x1b8   :  { %v1842_v49 = vpop.permute.xlu1 %1841  ;;  %v1912_v41 = vrot.slane %v1839_v61, %v1911_v16 }
 0x1b9   :  { %v1919_v31 = vrot.slane %v1842_v49, %v1918_v27 }
 0x1ba   :  { %v1914_v43 = vsel %vm1913_vm6, %v1912_v41, %v1907_v32 }
 0x1bb   :  { %v1921_v24 = vsel %vm1920_vm7, %v1919_v31, %v1914_v43  ;;  %v1857_v55 = vpop.permute.xlu0 %1856 }
 0x1bc   :  { %v1928_v33 = vsel %vm1927_vm8, %v1926_v18, %v1921_v24  ;;  %v1860_v38 = vpop.permute.xlu1 %1859  ;;  %v1954_v35 = vrot.slane %v1857_v55, %v1953_v39 }
 0x1bd   :  { %v1935_v45 = vsel %vm1934_vm9, %v1933_v2, %v1928_v33  ;;  %v1961_v21 = vrot.slane %v1860_v38, %v1960_v13 }
 0x1be   :  { %v1942_v37 = vsel %vm1941_vm10, %v1940_v10, %v1935_v45 }
 0x1bf   :  { %v1949_v6 = vsel %vm1948_vm11, %v1947_v29, %v1942_v37  ;;  %v1863_v17 = vpop.permute.xlu0 %1862 }
 0x1c0   :  { %v1956_v42 = vsel %vm1955_vm12, %v1954_v35, %v1949_v6  ;;  %v1866_v50 = vpop.permute.xlu1 %1865  ;;  %v1968_v23 = vrot.slane %v1863_v17, %v1967_v40 }
 0x1c1   :  { %v1975_v15 = vrot.slane %v1866_v50, %v1974_v51  ;;  %v1963_v54 = vsel %vm1962_vm13, %v1961_v21, %v1956_v42 }
 0x1c2   :  { %v1970_v11 = vsel %vm1969_vm14, %v1968_v23, %v1963_v54 }
 0x1c3   :  { %v1977_v5 = vsel %vm1976_vm15, %v1975_v15, %v1970_v11 }
 0x1c4   :  { %v1984_v57 = vrot.slane %v1977_v5, %v2229_v28 }
 0x1c6   :  { %v1991_v53 = vrot.slane %v1984_v57, %v2229_v28 }
 0x1c8   :  { %v1993_v56 = vadd.f32 %v1991_v53, %v234_v26 }
 0x1ca   :  { %1994 = vst [vmem:[#allocation2] sm:$0x1] %v1993_v56 }
 0x1d1   :  { %v1998_v9 = vld [vmem:[#allocation2] sm:$0x1] }
 0x1d2   :  { %v2001_v19 = vadd.f32 %v2000_v63, %v1998_v9 }
 0x1d4   :  { %v2002_v12 = vmul.f32 0.01, %v2001_v19 }
 0x1d6   :  { %v2003_v22 = vmax.f32 %v2001_v19, %v2002_v12 }
 0x1d8   :  { %2004 = vst [vmem:[%s2726_s3] sm:$0x1] %v2003_v22 }

</bundles_post_ra>
